<compile_context>
chip_gen: v5e
topology: v5e:2x2
jax: 0.10.0
libtpu: 0.0.40
codegen_flags: <defaults>
</compile_context>

<pallas_src>
import numpy as np
import jax
import jax.numpy as jnp
from jax.experimental import pallas as pl
from jax.experimental.pallas import tpu as pltpu

BIN_THRESH = 0.3  # kwargs.get('bin_thresh', 0.3) in the torch forward


# --------------------------------------------------------------------------
# small helpers
# --------------------------------------------------------------------------
def _vmem_limit(bytes_per_step: int) -> int:
    # Double-buffered in/out tiles + headroom, clamped so the limit stays safe
    # on v7x (64 MiB physical VMEM per TensorCore).
    return int(min(48 * 1024 * 1024, max(32 * 1024 * 1024, 4 * bytes_per_step)))


def _pick_tile(extent: int, target: int) -> int:
    """Largest multiple of 128 that divides `extent` and is <= target."""
    if extent % 128 != 0:
        return extent  # single full-extent block (always legal)
    tile = min(extent, max(128, (target // 128) * 128))
    while extent % tile != 0:
        tile -= 128
    return tile


# --------------------------------------------------------------------------
# Kernel 1: detection head (1x1 conv over C channels) + sigmoid + channel-max
#           threshold binarization.  Channels-first, HW on lanes, pure VPU.
# --------------------------------------------------------------------------
def det_seg_kernel(x_ref, w_ref, b_ref, out_map_ref, seg_ref):
    # x_ref      : [1, C, T] f32  (VMEM)  T = spatial tile, lane-dense
    # w_ref      : [C, K]    f32  (SMEM)  scalar-read weights
    # b_ref      : [K]       f32  (SMEM)
    # out_map_ref: [1, K, T] f32
    # seg_ref    : [1, 1, T] uint8 {0, 255}
    C = x_ref.shape[1]
    K = out_map_ref.shape[1]

    xs = [x_ref[0, c:c + 1, :] for c in range(C)]        # (1, T) each
    rows = []
    for k in range(K):                                   # K*C unrolled VPU FMAs
        acc = xs[0] * w_ref[0, k]
        for c in range(1, C):
            acc = acc + xs[c] * w_ref[c, k]
        rows.append(jax.nn.sigmoid(acc + b_ref[k]))      # EUP
    out_map_ref[0] = jnp.concatenate(rows, axis=0)       # (K, T) single store

    mx = rows[0]
    for k in range(1, K):
        mx = jnp.maximum(mx, rows[k])
    # np.where(amax(out_map, -1, keepdims) > thresh, 255, 0).astype(uint8)
    seg_ref[0] = jnp.where(mx > BIN_THRESH, 255, 0).astype(jnp.uint8)


def det_and_binarize(pages_nhwc, w_det, b_det, *, tile_target=16384):
    B, H, W, C = pages_nhwc.shape
    K = w_det.shape[1]
    HW = H * W

    # Layout plumbing (outside the kernel): spatial on lanes, channels on sublanes.
    x = jnp.transpose(pages_nhwc, (0, 3, 1, 2)).reshape(B, C, HW)

    tile_hw = _pick_tile(HW, tile_target)
    if B * (HW // tile_hw) < 2 and tile_hw % 256 == 0:
        tile_hw //= 2          # guarantee >= 2 parallel grid steps (v7x megacore)
    grid = (B, HW // tile_hw)
    step_bytes = (C + K) * tile_hw * 4 + tile_hw

    out_map, seg = pl.pallas_call(
        det_seg_kernel,
        out_shape=(
            jax.ShapeDtypeStruct((B, K, HW), jnp.float32),
            jax.ShapeDtypeStruct((B, 1, HW), jnp.uint8),
        ),
        grid=grid,
        in_specs=[
            pl.BlockSpec((1, C, tile_hw), lambda b, t: (b, 0, t)),
            pl.BlockSpec(memory_space=pltpu.MemorySpace.SMEM),   # w_det (C, K)
            pl.BlockSpec(memory_space=pltpu.MemorySpace.SMEM),   # b_det (K,)
        ],
        out_specs=(
            pl.BlockSpec((1, K, tile_hw), lambda b, t: (b, 0, t)),
            pl.BlockSpec((1, 1, tile_hw), lambda b, t: (b, 0, t)),
        ),
        compiler_params=pltpu.CompilerParams(
            dimension_semantics=("parallel", "parallel"),
            vmem_limit_bytes=_vmem_limit(step_bytes)),
    )(x, w_det, b_det)

    out_maps = jnp.transpose(out_map.reshape(B, K, H, W), (0, 2, 3, 1))
    seg_maps = seg.reshape(B, H, W, 1)                   # uint8 {0, 255}
    return out_maps, seg_maps


# --------------------------------------------------------------------------
# Kernel 2: synthetic recognition predictor on crops, computed transposed so
#           the crop axis (N) is lane-dense: logits [V, TILE_N].
# --------------------------------------------------------------------------
def reco_kernel(xT_ref, wT_ref, b_ref, ids_ref, conf_ref):
    # xT_ref : [F, TN] f32    wT_ref: [V, F] f32    b_ref: [V, 1] f32
    # ids_ref: [1, TN] int32  conf_ref: [1, TN] f32
    logits = jnp.dot(wT_ref[...], xT_ref[...],
                     preferred_element_type=jnp.float32) + b_ref[...]
    V = logits.shape[0]
    mx = jnp.max(logits, axis=0, keepdims=True)                       # (1, TN)
    iota = jax.lax.broadcasted_iota(jnp.int32, logits.shape, 0)
    # first index achieving the max ("first argmax" semantics)
    ids_ref[...] = jnp.min(jnp.where(logits == mx, iota, V),
                           axis=0, keepdims=True)
    denom = jnp.sum(jnp.exp(logits - mx), axis=0, keepdims=True)
    conf_ref[...] = pl.reciprocal(denom, approx=True)                 # EUP slot


def reco_predict(crop_feats, w_reco, b_reco, *, tile_n_target=512):
    N, F = crop_feats.shape
    V = w_reco.shape[1]
    n_pad = max(128, pl.cdiv(N, 128) * 128)              # lane-dense padding
    tile_n = _pick_tile(n_pad, tile_n_target)
    grid = (n_pad // tile_n,)

    xT = jnp.zeros((F, n_pad), jnp.float32).at[:, :N].set(
        crop_feats.astype(jnp.float32).T)
    wT = w_reco.T                                        # [V, F], resident
    b_col = b_reco.reshape(V, 1)
    step_bytes = (F + 2) * tile_n * 4 + (V * F + V * 128) * 4

    ids, conf = pl.pallas_call(
        reco_kernel,
        out_shape=(
            jax.ShapeDtypeStruct((1, n_pad), jnp.int32),
            jax.ShapeDtypeStruct((1, n_pad), jnp.float32),
        ),
        grid=grid,
        in_specs=[
            pl.BlockSpec((F, tile_n), lambda n: (0, n)),
            pl.BlockSpec((V, F), lambda n: (0, 0)),      # weights stay resident
            pl.BlockSpec((V, 1), lambda n: (0, 0)),      # bias stays resident
        ],
        out_specs=(
            pl.BlockSpec((1, tile_n), lambda n: (0, n)),
            pl.BlockSpec((1, tile_n), lambda n: (0, n)),
        ),
        compiler_params=pltpu.CompilerParams(
            dimension_semantics=("parallel",),
            vmem_limit_bytes=_vmem_limit(step_bytes)),
    )(xT, wT, b_col)
    return ids[0, :N].reshape(N, 1), conf[0, :N].reshape(N, 1)


# --------------------------------------------------------------------------
# KIEPredictor-like wrapper (synthetic det / reco heads, deterministic params)
# --------------------------------------------------------------------------
class KIEPredictorPallas:
    def __init__(self, in_channels=3, num_det_classes=2,
                 crop_size=8, vocab_size=16, seed=0):
        kd, kr, kb = jax.random.split(jax.random.PRNGKey(seed), 3)
        self.num_det_classes = num_det_classes
        self.crop_size = crop_size
        # detection head params (1x1 conv): [C, K], bias [K]
        self.w_det = jax.random.normal(kd, (in_channels, num_det_classes),
                                       jnp.float32) * 0.5
        self.b_det = jnp.zeros((num_det_classes,), jnp.float32)
        # recognition classifier params: [crop_size*crop_size*C, V], bias [V]
        feat = crop_size * crop_size * in_channels
        self.w_reco = jax.random.normal(kr, (feat, vocab_size),
                                        jnp.float32) * 0.1
        self.b_reco = jax.random.normal(kb, (vocab_size,), jnp.float32) * 0.05

    def _prepare_crops(self, pages_nhwc):
        # Glue: fixed-grid corner crops standing in for box-driven crop extraction.
        # TODO(synk): real crop extraction from predicted boxes (connected
        # components on seg maps) has no clean Pallas equivalent.
        B, H, W, C = pages_nhwc.shape
        cs = self.crop_size
        crops = []
        for b in range(B):
            for (y, x) in [(0, 0), (0, W - cs), (H - cs, 0), (H - cs, W - cs)]:
                crops.append(pages_nhwc[b, y:y + cs, x:x + cs, :].reshape(-1))
        return jnp.stack(crops, axis=0)                            # [N, F]

    def __call__(self, pages):
        # pages: list of (H, W, C) float arrays, as in the torch module.
        if any(p.ndim != 3 for p in pages):
            raise ValueError("incorrect input shape: all pages are expected "
                             "to be multi-channel 2D images.")
        origin_page_shapes = [p.shape[:2] for p in pages]
        pages_nhwc = jnp.stack([jnp.asarray(p, jnp.float32) for p in pages])

        # det_predictor(..., return_maps=True) + seg-map binarization (Pallas)
        out_maps, seg_maps = det_and_binarize(pages_nhwc, self.w_det,
                                              self.b_det)

        # TODO(synk): detect_orientation / straighten_pages / detect_language
        # (geometric numpy post-processing) have no Pallas equivalent.

        # reco_predictor over crops (Pallas tiled matmul + argmax + confidence)
        crop_feats = self._prepare_crops(pages_nhwc)
        word_ids, word_conf = reco_predict(crop_feats, self.w_reco,
                                           self.b_reco)

        # TODO(synk): DocumentBuilder assembly (nested python dataclasses) is
        # non-tensor glue; return a flat dict instead.
        return {
            "origin_page_shapes": origin_page_shapes,
            "out_maps": out_maps,          # [B, H, W, K] float32
            "seg_maps": seg_maps,          # [B, H, W, 1] uint8 {0, 255}
            "word_ids": word_ids,          # [N, 1] int32
            "word_confidences": word_conf, # [N, 1] float32
        }


if __name__ == "__main__":
    key = jax.random.PRNGKey(0)
    B, H, W, C = 2, 16, 16, 3
    pages = [np.asarray(jax.random.uniform(k, (H, W, C), jnp.float32))
             for k in jax.random.split(key, B)]

    predictor = KIEPredictorPallas(in_channels=C)
    out = predictor(pages)
    jax.block_until_ready((out["out_maps"], out["seg_maps"],
                           out["word_ids"], out["word_confidences"]))

    # --- correctness: detection head (exact VPU f32 math vs f64 reference) ---
    HW, K = H * W, predictor.num_det_classes
    x_np = np.stack(pages).astype(np.float64).reshape(B, HW, C)
    w_np = np.asarray(predictor.w_det, np.float64)
    b_np = np.asarray(predictor.b_det, np.float64)
    ref_maps = 1.0 / (1.0 + np.exp(-(x_np @ w_np + b_np)))
    got_maps = np.asarray(out["out_maps"]).reshape(B, HW, K)
    np.testing.assert_allclose(got_maps, ref_maps, atol=1e-4, rtol=1e-4)

    # --- correctness: seg binarization is consistent with the produced maps ---
    ref_seg = np.where(
        np.amax(np.asarray(out["out_maps"]), axis=-1, keepdims=True) > BIN_THRESH,
        255, 0).astype(np.uint8)
    assert out["seg_maps"].dtype == jnp.uint8
    assert out["seg_maps"].shape == (B, H, W, 1)
    assert np.array_equal(np.asarray(out["seg_maps"]), ref_seg)

    # --- correctness: recognition (loose tolerance; kernel matmul uses MXU) ---
    feats_np = np.asarray(predictor._prepare_crops(
        jnp.stack([jnp.asarray(p, jnp.float32) for p in pages])), np.float64)
    logits_np = (feats_np @ np.asarray(predictor.w_reco, np.float64)
                 + np.asarray(predictor.b_reco, np.float64))
    ref_ids = logits_np.argmax(-1)
    srt = np.sort(logits_np, axis=-1)
    well_sep = (srt[:, -1] - srt[:, -2]) > 0.05
    got_ids = np.asarray(out["word_ids"]).reshape(-1)
    assert np.all(got_ids[well_sep] == ref_ids[well_sep])
    ref_conf = 1.0 / np.sum(np.exp(logits_np - logits_np.max(-1, keepdims=True)),
                            axis=-1)
    got_conf = np.asarray(out["word_confidences"]).reshape(-1)
    np.testing.assert_allclose(got_conf, ref_conf, atol=5e-2, rtol=5e-2)

    print("KERNEL_OK")
</pallas_src>

<mosaic_0001>
module attributes {stable_mosaic.version = 11 : i64} {
  func.func @det_seg_kernel(%arg0: i32, %arg1: i32, %arg2: memref<1x3x256xf32, #tpu.memory_space<vmem>>, %arg3: memref<3x2xf32, #tpu.memory_space<smem>>, %arg4: memref<2xf32, #tpu.memory_space<smem>>, %arg5: memref<1x2x256xf32, #tpu.memory_space<vmem>>, %arg6: memref<1x1x256xi8, #tpu.memory_space<vmem>>) attributes {dimension_semantics = [#tpu.dimension_semantics<parallel>, #tpu.dimension_semantics<parallel>], iteration_bounds = array<i64: 2, 1>, scalar_prefetch = 0 : i64, scratch_operands = 0 : i64, tpu.core_type = #tpu.core_type<tc>, window_params = [{transform_indices = @transform_0, window_bounds = array<i64: 1, 3, 256>}, {transform_indices = @transform_1, window_bounds = array<i64: 3, 2>}, {transform_indices = @transform_2, window_bounds = array<i64: 2>}, {transform_indices = @transform_3, window_bounds = array<i64: 1, 2, 256>}, {transform_indices = @transform_4, window_bounds = array<i64: 1, 1, 256>}]} {
    %c0 = arith.constant 0 : index
    %c0_0 = arith.constant 0 : index
    %c0_1 = arith.constant 0 : index
    %0 = vector.load %arg2[%c0, %c0_0, %c0_1] : memref<1x3x256xf32, #tpu.memory_space<vmem>>, vector<1x1x256xf32>
    %1 = vector.shape_cast %0 : vector<1x1x256xf32> to vector<1x256xf32>
    %c0_2 = arith.constant 0 : index
    %c1 = arith.constant 1 : index
    %c0_3 = arith.constant 0 : index
    %2 = vector.load %arg2[%c0_2, %c1, %c0_3] : memref<1x3x256xf32, #tpu.memory_space<vmem>>, vector<1x1x256xf32>
    %3 = vector.shape_cast %2 : vector<1x1x256xf32> to vector<1x256xf32>
    %c0_4 = arith.constant 0 : index
    %c2 = arith.constant 2 : index
    %c0_5 = arith.constant 0 : index
    %4 = vector.load %arg2[%c0_4, %c2, %c0_5] : memref<1x3x256xf32, #tpu.memory_space<vmem>>, vector<1x1x256xf32>
    %5 = vector.shape_cast %4 : vector<1x1x256xf32> to vector<1x256xf32>
    %c0_6 = arith.constant 0 : index
    %c0_7 = arith.constant 0 : index
    %6 = memref.load %arg3[%c0_6, %c0_7] : memref<3x2xf32, #tpu.memory_space<smem>>
    %7 = vector.broadcast %6 : f32 to vector<1x256xf32>
    %8 = arith.mulf %1, %7 : vector<1x256xf32>
    %c1_8 = arith.constant 1 : index
    %c0_9 = arith.constant 0 : index
    %9 = memref.load %arg3[%c1_8, %c0_9] : memref<3x2xf32, #tpu.memory_space<smem>>
    %10 = vector.broadcast %9 : f32 to vector<1x256xf32>
    %11 = arith.mulf %3, %10 : vector<1x256xf32>
    %12 = arith.addf %8, %11 : vector<1x256xf32>
    %c2_10 = arith.constant 2 : index
    %c0_11 = arith.constant 0 : index
    %13 = memref.load %arg3[%c2_10, %c0_11] : memref<3x2xf32, #tpu.memory_space<smem>>
    %14 = vector.broadcast %13 : f32 to vector<1x256xf32>
    %15 = arith.mulf %5, %14 : vector<1x256xf32>
    %16 = arith.addf %12, %15 : vector<1x256xf32>
    %c0_12 = arith.constant 0 : index
    %17 = memref.load %arg4[%c0_12] : memref<2xf32, #tpu.memory_space<smem>>
    %18 = vector.broadcast %17 : f32 to vector<1x256xf32>
    %19 = arith.addf %16, %18 : vector<1x256xf32>
    %20 = arith.negf %19 : vector<1x256xf32>
    %21 = math.exp %20 : vector<1x256xf32>
    %cst = arith.constant 1.000000e+00 : f32
    %22 = vector.broadcast %cst : f32 to vector<1x256xf32>
    %23 = arith.addf %22, %21 : vector<1x256xf32>
    %24 = arith.divf %22, %23 : vector<1x256xf32>
    %c0_13 = arith.constant 0 : index
    %c1_14 = arith.constant 1 : index
    %25 = memref.load %arg3[%c0_13, %c1_14] : memref<3x2xf32, #tpu.memory_space<smem>>
    %26 = vector.broadcast %25 : f32 to vector<1x256xf32>
    %27 = arith.mulf %1, %26 : vector<1x256xf32>
    %c1_15 = arith.constant 1 : index
    %c1_16 = arith.constant 1 : index
    %28 = memref.load %arg3[%c1_15, %c1_16] : memref<3x2xf32, #tpu.memory_space<smem>>
    %29 = vector.broadcast %28 : f32 to vector<1x256xf32>
    %30 = arith.mulf %3, %29 : vector<1x256xf32>
    %31 = arith.addf %27, %30 : vector<1x256xf32>
    %c2_17 = arith.constant 2 : index
    %c1_18 = arith.constant 1 : index
    %32 = memref.load %arg3[%c2_17, %c1_18] : memref<3x2xf32, #tpu.memory_space<smem>>
    %33 = vector.broadcast %32 : f32 to vector<1x256xf32>
    %34 = arith.mulf %5, %33 : vector<1x256xf32>
    %35 = arith.addf %31, %34 : vector<1x256xf32>
    %c1_19 = arith.constant 1 : index
    %36 = memref.load %arg4[%c1_19] : memref<2xf32, #tpu.memory_space<smem>>
    %37 = vector.broadcast %36 : f32 to vector<1x256xf32>
    %38 = arith.addf %35, %37 : vector<1x256xf32>
    %39 = arith.negf %38 : vector<1x256xf32>
    %40 = math.exp %39 : vector<1x256xf32>
    %cst_20 = arith.constant 1.000000e+00 : f32
    %41 = vector.broadcast %cst_20 : f32 to vector<1x256xf32>
    %42 = arith.addf %41, %40 : vector<1x256xf32>
    %43 = arith.divf %41, %42 : vector<1x256xf32>
    %44 = tpu.concatenate %24, %43 in 0 : vector<1x256xf32>, vector<1x256xf32> -> vector<2x256xf32>
    %c0_21 = arith.constant 0 : index
    %c0_22 = arith.constant 0 : index
    %c0_23 = arith.constant 0 : index
    %45 = vector.load %arg5[%c0_21, %c0_22, %c0_23] : memref<1x2x256xf32, #tpu.memory_space<vmem>>, vector<1x2x256xf32>
    %46 = vector.shape_cast %45 : vector<1x2x256xf32> to vector<2x256xf32>
    %47 = vector.shape_cast %44 : vector<2x256xf32> to vector<1x2x256xf32>
    tpu.vector_store %arg5[%c0_21, %c0_22, %c0_23], %47 {strides = array<i32>} : memref<1x2x256xf32, #tpu.memory_space<vmem>>, vector<1x2x256xf32>,
    %48 = arith.maximumf %24, %43 : vector<1x256xf32>
    %cst_24 = arith.constant 3.000000e-01 : f32
    %49 = vector.broadcast %cst_24 : f32 to vector<1x256xf32>
    %50 = arith.cmpf ogt, %48, %49 : vector<1x256xf32>
    %c255_i32 = arith.constant 255 : i32
    %c0_i32 = arith.constant 0 : i32
    %51 = vector.broadcast %c255_i32 : i32 to vector<1x256xi32>
    %52 = vector.broadcast %c0_i32 : i32 to vector<1x256xi32>
    %53 = arith.select %50, %51, %52 : vector<1x256xi1>, vector<1x256xi32>
    %54 = arith.trunci %53 : vector<1x256xi32> to vector<1x256xi8>
    %c0_25 = arith.constant 0 : index
    %c0_26 = arith.constant 0 : index
    %c0_27 = arith.constant 0 : index
    %55 = vector.load %arg6[%c0_25, %c0_26, %c0_27] : memref<1x1x256xi8, #tpu.memory_space<vmem>>, vector<1x1x256xi8>
    %56 = vector.shape_cast %55 : vector<1x1x256xi8> to vector<1x256xi8>
    %57 = vector.shape_cast %54 : vector<1x256xi8> to vector<1x1x256xi8>
    tpu.vector_store %arg6[%c0_25, %c0_26, %c0_27], %57 {strides = array<i32>} : memref<1x1x256xi8, #tpu.memory_space<vmem>>, vector<1x1x256xi8>,
    return
  }
  func.func @transform_0(%arg0: i32, %arg1: i32) -> (i32, i32, i32) {
    %c0_i32 = arith.constant 0 : i32
    %c0_i32_0 = arith.constant 0 : i32
    return %arg0, %c0_i32, %arg1 : i32, i32, i32
  }
  func.func @transform_1(%arg0: i32, %arg1: i32) -> (i32, i32) {
    %c0_i32 = arith.constant 0 : i32
    %c0_i32_0 = arith.constant 0 : i32
    %c0_i32_1 = arith.constant 0 : i32
    return %c0_i32, %c0_i32_0 : i32, i32
  }
  func.func @transform_2(%arg0: i32, %arg1: i32) -> i32 {
    %c0_i32 = arith.constant 0 : i32
    %c0_i32_0 = arith.constant 0 : i32
    return %c0_i32 : i32
  }
  func.func @transform_3(%arg0: i32, %arg1: i32) -> (i32, i32, i32) {
    %c0_i32 = arith.constant 0 : i32
    %c0_i32_0 = arith.constant 0 : i32
    return %arg0, %c0_i32, %arg1 : i32, i32, i32
  }
  func.func @transform_4(%arg0: i32, %arg1: i32) -> (i32, i32, i32) {
    %c0_i32 = arith.constant 0 : i32
    %c0_i32_0 = arith.constant 0 : i32
    return %arg0, %c0_i32, %arg1 : i32, i32, i32
  }
}

</mosaic_0001>

<bundles_post_ra>
// kernel: tpu_custom_call.1
= control target key start
LH: loop header
LB: loop body
LE: loop exit
PB: predicated region body
PF: predicated region fallthrough
CT: control target
= control target key end

     0   :  { %10 = vsyncpa [#allocation4], 0  ;;  %s969_s0 = inlined_call_operand.vmem [shape: f32[2,3,256], index: 0, kind: input, shape index: {}]   ;;  %s970_s1 = inlined_call_operand.vmem [shape: f32[3,2], index: 1, kind: input, shape index: {}]   ;;  %s971_s2 = inlined_call_operand.vmem [shape: f32[2], index: 2, kind: input, shape index: {}]   ;;  %s972_s3 = inlined_call_operand.hbm [shape: f32[2,2,256], index: 3, kind: output, shape index: {0}]   ;;  %s973_s4 = inlined_call_operand.vmem [shape: u8[2,1,256], index: 4, kind: output, shape index: {1}]  }
   0x1   :  { %11 = vsyncpa [#allocation6], 0 }
   0x2   :  { %12 = vsyncpa [#allocation3], 0 }
   0x3   :  { %14 = vsyncpa [#allocation3 + $0x1], 0  ;;  %s813_s15 = smov 0   ;;  %s815_s16 = smov 0  }
   0x4   :  { %s817_s17 = smov 0   ;;  %s819_s18 = smov 0  }
   0x5   :  { %s821_s19 = smov 0   ;;  %s823_s20 = smov 0  }
   0x6 LB: > { %s552_s21 = sadd.s32 4294967295, %s783_s20   ;;  %s553_s22 = sadd.s32 4294967294, %s783_s20   ;;  %s783_s20 = sphi %s823_s20, %s20_s20   ;;  %s779_s19 = sphi %s821_s19, %s987_s19   ;;  %s775_s18 = sphi %s819_s18, %s986_s18   ;;  %s771_s17 = sphi %s817_s17, %s985_s17   ;;  %s767_s16 = sphi %s815_s16, %s984_s16   ;;  %s763_s15 = sphi %s813_s15, %s983_s15  }
   0x7   : > { %s32_s23 = sadd.s32 1, %s779_s19  ;;  %s111_s24 = sadd.s32 1, %s771_s17 }
   0x8   : > { %p34_p0 = scmp.ge.s32.totalorder %s32_s23, 2  ;;  %p121_p1 = scmp.ne.s32.totalorder %s771_s17, %s767_s16 }
   0x9   : > { %p122_p2 = scmp.eq.s32.totalorder %s552_s21, 1  ;;  %p127_p3 = scmp.ne.s32.totalorder %s767_s16, %s763_s15 }
   0xa   : > { %s989_s23 = smov (%p34_p0, %s32_s23), 0  ;;  %p128_p5 = scmp.eq.s32.totalorder %s553_s22, 1 }
   0xb   : > { %p853_p4 = por %p122_p2, %p121_p1  ;;  %s106_s26 = ssub.s32 %s779_s19, %s989_s23 }
   0xc   : > { %p554_p6 = scmp.ge.s32.totalorder %s783_s20, 1  ;;  %p109_p7 = scmp.eq.s32.totalorder %s106_s26, 0 }
   0xd   : > { %p860_p8 = por %p128_p5, %p127_p3  ;;  %p163_p9 = scmp.lt.s32.totalorder %s783_s20, 3 }
   0xe   : > { %s866_s28 = scalar_select %p109_p7, %s771_s17, %s111_s24  }
   0xf   : > { %p164_p10 = pnand %p554_p6, %p163_p9  ;;  %p868_p11 = scmp.eq.s32.totalorder %s552_s21, 0 }
  0x10   : > { %s175_s6 = sshll.u32 %s970_s1, 4  ;;  %s185_s9 = sshll.u32 %s971_s2, 4  ;;  %s176_s6 = int_to_ptr.vmem [resolvable:$true] %s175_s6  ;;  %s186_s9 = int_to_ptr.vmem [resolvable:$true] %s185_s9 }
  0x11   : > { %p592_p12 = pneg %p164_p10  ;;  %s785_s10 = smov [#allocation2]  }
  0x12   : > { %s786_s11 = smov [#allocation5]   ;;  %211 = sbr.rel (%p164_p10) target bundleno = 93 (0x5d), region = 32 }
  0x13   : > { %p593_p13 = pnand %p868_p11, %p592_p12 }
  0x15   : > { %595 = dma.vmem_to_smem (!%p593_p13), %s176_s6, 64, %s785_s10, [#allocation4]  }
  0x16   : > { %598 = dma.vmem_to_smem (!%p593_p13), %s186_s9, 16, %s786_s11, [#allocation6]  }
  0x17   : > { %750 = dma.done.wait (%p868_p11), [#allocation4], 64  }
  0x18   : > { %752 = vsyncadd (%p868_p11), [#allocation4], 4294967232 }
  0x19   : > { %754 = dma.done.wait (%p868_p11), [#allocation6], 16  }
  0x1a   : > { %756 = vsyncadd (%p868_p11), [#allocation6], 4294967280 }
  0x1b   : > { %223 = sfence }
  0x1c   : > { %p257_p0 = scmp.lt.s32.totalorder %s775_s18, 1  ;;  %s281_s12 = sld [smem:[#allocation2]]  ;;  %vm357_vm8 = vcmask 1040384   ;;  %vm363_vm9 = vcmask 1041408   ;;  %v787_v58 = vmov 0   ;;  %vm384_vm12 = vcmask 1041409  }
  0x1d   : > { %s567_s13 = sld [smem:[#allocation2 + $0x80]]  ;;  %s243_s9 = sand.u32 1, %s767_s16   ;;  %vm382_vm11 = vsmask.f32 0  ;;  %vm385_vm13 = vsmask.f32 1024 }
  0x1e   : > { %s890_s14 = scalar_select %p257_p0, %s775_s18, 1  ;;  %vm922_vm14 = vmand %vm357_vm8, %vm382_vm11 }
  0x1f   : > { %s568_s21 = sld [smem:[#allocation2 + $0x100]]  ;;  %s905_s10 = sshll.u32 %s243_s9, 2  ;;  %vm926_vm15 = vmand %vm384_vm12, %vm385_vm13 }
  0x20   : > { %s580_s22 = sshll.u32 %s890_s14, 3  ;;  %s292_s24 = sld [smem:[#allocation5]] }
  0x21   : > { %s264_s5 = scalar_lea.vmem %s969_s0, %s580_s22  ;;  %s570_s6 = sld [smem:[#allocation2 + $0x1]] }
  0x22   : > { %v276_v0 = vld [vmem:[%s264_s5] ss:$4 sm:$0x3]  ;;  %v565_v1 = vld [vmem:[%s264_s5 + $0x1] ss:$4 sm:$0x3]  ;;  %v282_v2 = vstv %s281_s12 }
  0x23   : > { %v566_v3 = vld [vmem:[%s264_s5 + $0x2] ss:$4 sm:$0x3]  ;;  %v283_v4 = vmul.f32 %v282_v2, %v276_v0  ;;  %v285_v5 = vstv %s567_s13  ;;  %s571_s29 = sld [smem:[#allocation2 + $0x81]]  ;;  %s581_s11 = sshll.u32 %s775_s18, 2 }
  0x24   : > { %v286_v6 = vmul.f32 %v565_v1, %v285_v5  ;;  %s572_s7 = sld [smem:[#allocation2 + $0x101]]  ;;  %s245_s22 = scalar_lea.vmem [#allocation7], %s905_s10 }
  0x25   : > { %v289_v7 = vstv %s568_s21  ;;  %s573_s8 = sld [smem:[#allocation5 + $0x1]]  ;;  %s413_s21 = scalar_lea.hbm %s972_s3, %s581_s11 }
  0x26   : > { %v287_v8 = vadd.f32 %v286_v6, %v283_v4  ;;  %v290_v9 = vmul.f32 %v566_v3, %v289_v7  ;;  %v293_v10 = vstv %s292_s24  ;;  %s912_s24 = sshll.u32 %s245_s22, 4  ;;  %s417_s18 = sshll.u32 %s413_s21, 4  ;;  %s416_s24 = int_to_ptr.vmem [resolvable:$true] %s912_s24  ;;  %s418_s18 = int_to_ptr.hbm [resolvable:$true] %s417_s18 }
  0x27   : > { %v315_v11 = vstv %s570_s6  ;;  %s564_s26 = sshll.u32 %s890_s14, 1  ;;  %s392_s14 = scalar_lea.sflag [#allocation3], %s243_s9 }
  0x28   : > { %v291_v12 = vadd.f32 %v290_v9, %v287_v8  ;;  %v316_v13 = vmul.f32 %v315_v11, %v276_v0  ;;  %s274_s6 = scalar_lea.vmem %s973_s4, %s564_s26  ;;  %s717_s11 = scalar_lea.hbm %s972_s3, 8 }
  0x29   : > { %v318_v14 = vstv %s571_s29  ;;  %s711_s29 = sshra.s32 %s418_s18, 4  ;;  %s712_s29 = int_to_ptr.hbm [resolvable:$true] %s711_s29 }
  0x2a   : > { %v294_v15 = vadd.f32 %v293_v10, %v291_v12  ;;  %v319_v16 = vmul.f32 %v565_v1, %v318_v14  ;;  %v322_v17 = vstv %s572_s7  ;;  %s713_s7 = scalar_lea.hbm %s712_s29, 4  ;;  %p718_p5 = scmp.lt.s32.totalorder %s712_s29, %s972_s3 }
  0x2b   : > { %v323_v18 = vmul.f32 %v566_v3, %v322_v17  ;;  %v326_v21 = vstv %s573_s8  ;;  %p714_p1 = scmp.ne.s32.totalorder %s712_s29, %s713_s7  ;;  %p719_p6 = scmp.lt.s32.totalorder %s717_s11, %s713_s7 }
  0x2c   : > { %v569_v19 = vmul.f32 -1.442695, %v294_v15  ;;  %v320_v20 = vadd.f32 %v319_v16, %v316_v13 }
  0x2d   : > { %p715_p2 = pnand %p714_p1, %p853_p4  ;;  %p720_p7 = por %p719_p6, %p718_p5 }
  0x2e   : > { %659 = vpow2.f32 %v569_v19  ;;  %v324_v22 = vadd.f32 %v323_v18, %v320_v20 }
  0x2f   : > { %p716_p3 = pneg %p715_p2 }
  0x30   : > { %v327_v23 = vadd.f32 %v326_v21, %v324_v22 }
  0x31   : > { %p721_p9 = pnand %p720_p7, %p716_p3 }
  0x32   : > { %v574_v24 = vmul.f32 -1.442695, %v327_v23 }
  0x34   : > { %v660_v25 = vpop.eup %659  ;;  %661 = vpow2.f32 %v574_v24 }
  0x35   : > { %v298_v26 = vadd.f32 1.0, %v660_v25 }
  0x37   : > { %663 = vrcp.f32 %v298_v26  ;;  %vm304_vm0 = vweird.f32 %v298_v26  ;;  %v310_v34 = vand.u32 2147483648, %v298_v26  ;;  %v308_v36 = vand.u32 2147483647, %v298_v26 }
  0x39   : > { %v311_v42 = vor.u32 1.1754944e-38, %v310_v34  ;;  %vm309_vm5 = vcmp.eq.f32.partialorder %v308_v36, 8.507059e+37 }
  0x3a   : > { %v662_v27 = vpop.eup %661 }
  0x3b   : > { %v331_v28 = vadd.f32 1.0, %v662_v27 }
  0x3d   : > { %v664_v29 = vpop.eup %663  ;;  %665 = vrcp.f32 %v331_v28  ;;  %v343_v39 = vand.u32 2147483648, %v331_v28  ;;  %vm337_vm3 = vweird.f32 %v331_v28  ;;  %v341_v41 = vand.u32 2147483647, %v331_v28 }
  0x3e   : > { %v300_v30 = vmul.f32 %v664_v29, %v298_v26  ;;  %vm305_vm1 = vweird.f32 %v664_v29 }
  0x3f   : > { %vm896_vm2 = vmor %vm304_vm0, %vm305_vm1  ;;  %v344_v45 = vor.u32 1.1754944e-38, %v343_v39  ;;  %vm342_vm7 = vcmp.eq.f32.partialorder %v341_v41, 8.507059e+37 }
  0x40   : > { %v301_v31 = vsub.f32 1.0, %v300_v30 }
  0x42   : > { %v302_v32 = vmul.f32 %v664_v29, %v301_v31 }
  0x43   : > { %v666_v33 = vpop.eup %665 }
  0x44   : > { %v303_v35 = vadd.f32 %v664_v29, %v302_v32  ;;  %v333_v37 = vmul.f32 %v666_v33, %v331_v28  ;;  %vm338_vm4 = vweird.f32 %v666_v33 }
  0x45   : > { %vm339_vm6 = vmor %vm337_vm3, %vm338_vm4 }
  0x46   : > { %v334_v40 = vsub.f32 1.0, %v333_v37  ;;  %v307_v43 = vsel %vm896_vm2, %v664_v29, %v303_v35 }
  0x47   : > { %v312_v47 = vsel %vm309_vm5, %v311_v42, %v307_v43 }
  0x48   : > { %v335_v44 = vmul.f32 %v666_v33, %v334_v40  ;;  %v348_v49 = vperm.slane %v312_v47, 0  ;;  %v349_v50 = vperm.slane %v312_v47, 1 }
  0x4a   : > { %v336_v46 = vadd.f32 %v666_v33, %v335_v44 }
  0x4c   : > { %v340_v48 = vsel %vm339_vm6, %v666_v33, %v336_v46 }
  0x4d   : > { %v345_v51 = vsel %vm342_vm7, %v344_v45, %v340_v48 }
  0x4e   : > { %v353_v52 = vperm.slane %v345_v51, 0  ;;  %v354_v53 = vperm.slane %v345_v51, 1  ;;  %v367_v54 = vmax.f32 %v312_v47, %v345_v51 }
  0x50   : > { %v358_v55 = vsel %vm357_vm8, %v348_v49, %v353_v52  ;;  %v359_v56 = vsel %vm357_vm8, %v349_v50, %v354_v53  ;;  %vm368_vm10 = vcmp.gt.f32.partialorder %v367_v54, 0.3 }
  0x51   : > { %v362_v57 = vrot.slane %v359_v56, 6  ;;  %v369_v59 = vsel %vm368_vm10, 255, %v787_v58 }
  0x52   : > { %v370_v60 = vperm.slane %v369_v59, 0  ;;  %v371_v61 = vperm.slane %v369_v59, 1 }
  0x53   : > { %v364_v62 = vsel %vm363_vm9, %v358_v55, %v362_v57 }
  0x54   : > { %366 = vst [vmem:[%s245_s22] sm:$0xf] %v364_v62  ;;  %v372_v63 = vpack.c.b16 %v370_v60, %v370_v60  ;;  %v374_v0 = vpack.c.b16 %v371_v61, %v371_v61 }
  0x55   : > { %724 = shalt.err (!%p721_p9)
}
  0x56   : > { %590 = dma.vmem_to_hbm [thread:$0]  (%p853_p4), %s416_s24, 64, %s418_s18, %s392_s14   ;;  %v373_v3 = vpack.c.b8 %v372_v63, %v372_v63  ;;  %v375_v4 = vpack.c.b8 %v374_v0, %v374_v0  ;;  %vm387_vm0 = vmor %vm926_vm15, %vm922_vm14  ;;  %v388_v6 = vld [vmem:[%s274_s6] sm:$0x3] }
  0x58   : > { %v376_v5 = vrot.slane %v375_v4, 7 }
  0x5a   : > { %v379_v7 = vsel %vm357_vm8, %v373_v3, %v376_v5 }
  0x5b   : > { %v389_v8 = vsel %vm387_vm0, %v379_v7, %v388_v6 }
  0x5c   : > { %390 = vst [vmem:[%s274_s6] sm:$0x3] %v389_v8 }
  0x5d PF: > { %p607_p10 = scmp.ge.s32.totalorder %s783_s20, 2  ;;  %s433_s25 = sand.u32 1, %s763_s15  }
  0x5e   : > { %s434_s9 = scalar_lea.sflag [#allocation3], %s433_s25 }
  0x5f   : > { %p600_p4 = pnand %p607_p10, %p860_p8 }
  0x61   : > { %p601_p11 = pneg %p600_p4 }
  0x63   : > { %758 = dma.done.wait (%p601_p11), %s434_s9, 64  }
  0x64   : > { %760 = vsyncadd (%p601_p11), %s434_s9, 4294967232  ;;  %s20_s20 = sadd.s32 1, %s783_s20   ;;  %s983_s15 = smov %s767_s16 }
  0x65   : > { %p17_p12 = scmp.ge.s32.totalorder %s20_s20, 4   ;;  %s984_s16 = smov %s771_s17 }
  0x66   : > { %s985_s17 = smov %s866_s28  ;;  %s986_s18 = smov %s779_s19 }
  0x67   : > { %s987_s19 = smov %s989_s23  ;;  %19 = sbr.rel (!%p17_p12) target bundleno = 6 (0x6), region = 90 }
  0x6c   :  { %451 = vsyncpa [#allocation3], 1 }
  0x6d   :  { %453 = vsyncpa [#allocation3 + $0x1], 1 }
  0x6e   :  { %454 = vsyncpa [#allocation4], 1 }
  0x6f   :  { %456 = vsyncpa [#allocation4 + $0x1], 1 }
  0x70   :  { %457 = vsyncpa [#allocation6], 1 }

</bundles_post_ra>
